<compile_context>
chip_gen: v7x
topology: tpu7x:2x2x1
jax: 0.10.0
libtpu: 0.0.40
codegen_flags: <defaults>
</compile_context>

<pallas_src>
import functools

import jax
import jax.numpy as jnp
from jax import lax
from jax.experimental import pallas as pl
from jax.experimental.pallas import tpu as pltpu


# --------------------------------------------------------------------------
# Kernel
# --------------------------------------------------------------------------
def _cos_partial_kernel(x1_ref, x2_ref, out_ref, *, feat, num_groups,
                        rows_packed, mask_tail):
    """Partial sum of per-row cosine similarities for one (row_tile, G*feat) block."""
    row_tile = x1_ref.shape[0]
    eps2 = jnp.float32(1e-16)  # torch eps = 1e-8, clamp applied to s1 * s2

    # Static loop over the G packed lane segments (G is small: <= 128//feat).
    acc = jnp.zeros((row_tile, 1), jnp.float32)
    for g in range(num_groups):
        lo = g * feat
        a = x1_ref[:, lo:lo + feat].astype(jnp.float32)
        b = x2_ref[:, lo:lo + feat].astype(jnp.float32)
        dot = jnp.sum(a * b, axis=-1, keepdims=True)   # (row_tile, 1)
        s1 = jnp.sum(a * a, axis=-1, keepdims=True)
        s2 = jnp.sum(b * b, axis=-1, keepdims=True)
        # torch: cos = dot / sqrt(clamp(s1*s2, eps^2)); rsqrt runs on the EUP.
        acc = acc + dot * lax.rsqrt(jnp.maximum(s1 * s2, eps2))

    if mask_tail:
        # The last grid step's input block extends past the true packed-row
        # count.  The over-read rows hold unspecified data (possibly NaN/Inf
        # after rsqrt), but select never propagates values from the
        # unselected branch, so zeroing them here is safe.
        row_ids = pl.program_id(0) * row_tile + lax.broadcasted_iota(
            jnp.int32, (row_tile, 1), 0)
        acc = jnp.where(row_ids < rows_packed, acc, jnp.float32(0.0))

    tile_sum = jnp.sum(acc, axis=0, keepdims=True)      # (1, 1)
    # Output block is (8, 1) to respect the (8, 128)-divisibility rule; the
    # tile's partial sum lands in row 0, rows 1..7 are zero.
    slot = lax.broadcasted_iota(jnp.int32, (8, 1), 0)
    out_ref[...] = jnp.where(slot == 0, tile_sum, jnp.float32(0.0))


# --------------------------------------------------------------------------
# Tiling / packing heuristics
# --------------------------------------------------------------------------
def _vmem_capacity_bytes():
    try:
        return int(pltpu.get_tpu_info().vmem_capacity_bytes)
    except Exception:
        return 64 << 20  # most conservative assumption (v7x-like per-TC VMEM)


def _pick_packing(rows, feat):
    """Largest G <= 128//feat that divides rows (lane-density repack factor)."""
    if feat >= 128 or rows <= 1:
        return 1
    g_max = min(128 // feat, rows)
    for g in range(g_max, 0, -1):
        if rows % g == 0:
            return g
    return 1


def _plan_row_tiling(rows_packed, feat_packed, feat, itemsize):
    """Pick (row_tile, num_tiles, mask_tail, vmem_limit) for the streaming loop."""
    vmem_phys = _vmem_capacity_bytes()
    if vmem_phys <= (64 << 20):
        # v7x-like: 64 MiB VMEM / TC, 2 TensorCores share the parallel axis.
        target_block_bytes = 5 << 20
        scoped_cap = 48 << 20
        min_grid = 4
    else:
        # v5e / v6e: 128 MiB VMEM, single TensorCore.
        target_block_bytes = 8 << 20
        scoped_cap = 80 << 20
        min_grid = 1

    packed_row_bytes = feat_packed * itemsize
    # Per grid step: 2 inputs x 2 pipeline buffers x block, plus ~3 f32
    # (row_tile, feat) temporaries from the segmented loop, plus slack.
    bytes_per_row = 4 * packed_row_bytes + 3 * feat * 4

    row_tile = max(8, (target_block_bytes // packed_row_bytes) // 8 * 8)
    row_tile = min(row_tile,
                   max(8, ((scoped_cap - (2 << 20)) // bytes_per_row) // 8 * 8))
    # Keep at least `min_grid` grid steps so both TensorCores stay busy (v7x).
    if min_grid > 1 and rows_packed // min_grid >= 8:
        row_tile = min(row_tile, (rows_packed // min_grid) // 8 * 8)

    if row_tile >= rows_packed:
        # Single full block; block dims equal the array dims (always legal).
        row_tile = rows_packed
        num_tiles = 1
        mask_tail = False
    else:
        num_tiles = -(-rows_packed // row_tile)
        mask_tail = num_tiles * row_tile != rows_packed

    vmem_need = row_tile * bytes_per_row + (2 << 20)
    vmem_limit = int(min(scoped_cap, max(32 << 20, vmem_need)))
    return row_tile, num_tiles, mask_tail, vmem_limit


# --------------------------------------------------------------------------
# Wrapper
# --------------------------------------------------------------------------
def negative_cosine_similarity_loss(x1, x2, *, _force_row_tile=None):
    """loss = 1 - mean_over_leading_dims(cosine_similarity(x1, x2, dim=-1))."""
    assert x1.shape == x2.shape, "x1 and x2 must have the same shape"
    feat = x1.shape[-1]
    rows = 1
    for d in x1.shape[:-1]:
        rows *= d
    itemsize = max(jnp.dtype(x1.dtype).itemsize, jnp.dtype(x2.dtype).itemsize)

    # Lane-density repacking for small feature dims (free reshape).
    G = _pick_packing(rows, feat)
    feat_packed = G * feat
    rows_packed = rows // G
    x1p = x1.reshape(rows_packed, feat_packed)
    x2p = x2.reshape(rows_packed, feat_packed)

    row_tile, num_tiles, mask_tail, vmem_limit = _plan_row_tiling(
        rows_packed, feat_packed, feat, itemsize)

    if _force_row_tile is not None and _force_row_tile < rows_packed:
        # Test-only hook: force small tiles to exercise multi-tile / masking.
        assert _force_row_tile % 8 == 0
        row_tile = _force_row_tile
        num_tiles = -(-rows_packed // row_tile)
        mask_tail = num_tiles * row_tile != rows_packed

    kernel = functools.partial(
        _cos_partial_kernel,
        feat=feat,
        num_groups=G,
        rows_packed=rows_packed,
        mask_tail=mask_tail,
    )

    cost = pl.CostEstimate(
        flops=6 * rows * feat + 5 * rows,
        transcendentals=rows,                      # one rsqrt per logical row
        bytes_accessed=2 * rows * feat * itemsize + num_tiles * 8 * 4,
    )

    partials = pl.pallas_call(
        kernel,
        out_shape=jax.ShapeDtypeStruct((num_tiles * 8, 1), jnp.float32),
        grid_spec=pltpu.PrefetchScalarGridSpec(
            num_scalar_prefetch=0,
            grid=(num_tiles,),
            in_specs=[
                pl.BlockSpec((row_tile, feat_packed), lambda i: (i, 0)),
                pl.BlockSpec((row_tile, feat_packed), lambda i: (i, 0)),
            ],
            out_specs=pl.BlockSpec((8, 1), lambda i: (i, 0)),
        ),
        compiler_params=pltpu.CompilerParams(
            dimension_semantics=("parallel",),
            vmem_limit_bytes=vmem_limit,
        ),
        cost_estimate=cost,
    )(x1p, x2p)

    # Each tile contributed one scalar (rows 1..7 of its block are zero).
    return jnp.float32(1.0) - jnp.sum(partials) / jnp.float32(rows)


# --------------------------------------------------------------------------
# Pure-JAX reference (modern torch eps semantics) and self-test
# --------------------------------------------------------------------------
def _reference(x1, x2):
    eps = 1e-8
    x1 = x1.astype(jnp.float32)
    x2 = x2.astype(jnp.float32)
    dot = jnp.sum(x1 * x2, axis=-1)
    s1 = jnp.sum(x1 * x1, axis=-1)
    s2 = jnp.sum(x2 * x2, axis=-1)
    cos = dot / jnp.sqrt(jnp.maximum(s1 * s2, eps * eps))
    return 1.0 - jnp.mean(cos)


if __name__ == "__main__":
    key = jax.random.PRNGKey(0)

    # 1) Module-consistent small shape: (batch=2, seq=4, hidden=32).
    k1, k2, key = (*jax.random.split(key, 2), key)
    a = jax.random.normal(k1, (2, 4, 32), dtype=jnp.float32)
    b = jax.random.normal(k2, (2, 4, 32), dtype=jnp.float32)
    loss = jax.block_until_ready(negative_cosine_similarity_loss(a, b))
    ref = _reference(a, b)
    assert jnp.allclose(loss, ref, atol=1e-5, rtol=1e-5), (loss, ref)

    # 2) No-packing path (feat not packable for these rows), single block.
    k1, k2, key = (*jax.random.split(key, 2), key)
    a = jax.random.normal(k1, (3, 5, 48), dtype=jnp.float32)
    b = jax.random.normal(k2, (3, 5, 48), dtype=jnp.float32)
    loss = jax.block_until_ready(negative_cosine_similarity_loss(a, b))
    ref = _reference(a, b)
    assert jnp.allclose(loss, ref, atol=1e-5, rtol=1e-5), (loss, ref)

    # 3) Multi-tile parallel grid (forced small row tile), evenly divisible.
    k1, k2, key = (*jax.random.split(key, 2), key)
    a = jax.random.normal(k1, (8, 8, 32), dtype=jnp.float32)
    b = jax.random.normal(k2, (8, 8, 32), dtype=jnp.float32)
    loss = jax.block_until_ready(
        negative_cosine_similarity_loss(a, b, _force_row_tile=8))
    ref = _reference(a, b)
    assert jnp.allclose(loss, ref, atol=1e-5, rtol=1e-5), (loss, ref)

    # 4) Multi-tile with a masked / over-read tail block.
    k1, k2 = jax.random.split(key)
    a = jax.random.normal(k1, (9, 8, 32), dtype=jnp.float32)
    b = jax.random.normal(k2, (9, 8, 32), dtype=jnp.float32)
    loss = jax.block_until_ready(
        negative_cosine_similarity_loss(a, b, _force_row_tile=8))
    ref = _reference(a, b)
    assert jnp.allclose(loss, ref, atol=1e-5, rtol=1e-5), (loss, ref)

    print("KERNEL_OK")
</pallas_src>

<mosaic_0001>
module attributes {stable_mosaic.version = 11 : i64} {
  func.func @_cos_partial_kernel(%arg0: i32, %arg1: memref<2x128xf32, #tpu.memory_space<vmem>>, %arg2: memref<2x128xf32, #tpu.memory_space<vmem>>, %arg3: memref<8x1xf32, #tpu.memory_space<vmem>>) attributes {dimension_semantics = [#tpu.dimension_semantics<parallel>], iteration_bounds = array<i64: 1>, scalar_prefetch = 0 : i64, scratch_operands = 0 : i64, tpu.core_type = #tpu.core_type<tc>, window_params = [{transform_indices = @transform_0, window_bounds = array<i64: 2, 128>}, {transform_indices = @transform_1, window_bounds = array<i64: 2, 128>}, {transform_indices = @transform_2, window_bounds = array<i64: 8, 1>}]} {
    %cst = arith.constant 0.000000e+00 : f32
    %0 = vector.broadcast %cst : f32 to vector<2x1xf32>
    %c0 = arith.constant 0 : index
    %c0_0 = arith.constant 0 : index
    %1 = vector.load %arg1[%c0, %c0_0] : memref<2x128xf32, #tpu.memory_space<vmem>>, vector<2x32xf32>
    %c0_1 = arith.constant 0 : index
    %c0_2 = arith.constant 0 : index
    %2 = vector.load %arg2[%c0_1, %c0_2] : memref<2x128xf32, #tpu.memory_space<vmem>>, vector<2x32xf32>
    %3 = arith.mulf %1, %2 : vector<2x32xf32>
    %cst_3 = arith.constant dense<0.000000e+00> : vector<2xf32>
    %4 = vector.multi_reduction <add>, %3, %cst_3 [1] : vector<2x32xf32> to vector<2xf32>
    %5 = vector.shape_cast %4 : vector<2xf32> to vector<2x1xf32>
    %6 = arith.mulf %1, %1 : vector<2x32xf32>
    %cst_4 = arith.constant dense<0.000000e+00> : vector<2xf32>
    %7 = vector.multi_reduction <add>, %6, %cst_4 [1] : vector<2x32xf32> to vector<2xf32>
    %8 = vector.shape_cast %7 : vector<2xf32> to vector<2x1xf32>
    %9 = arith.mulf %2, %2 : vector<2x32xf32>
    %cst_5 = arith.constant dense<0.000000e+00> : vector<2xf32>
    %10 = vector.multi_reduction <add>, %9, %cst_5 [1] : vector<2x32xf32> to vector<2xf32>
    %11 = vector.shape_cast %10 : vector<2xf32> to vector<2x1xf32>
    %12 = arith.mulf %8, %11 : vector<2x1xf32>
    %cst_6 = arith.constant 1.000000e-16 : f32
    %13 = vector.broadcast %cst_6 : f32 to vector<2x1xf32>
    %14 = arith.maximumf %12, %13 : vector<2x1xf32>
    %15 = math.rsqrt %14 : vector<2x1xf32>
    %16 = arith.mulf %5, %15 : vector<2x1xf32>
    %17 = arith.addf %0, %16 : vector<2x1xf32>
    %c0_7 = arith.constant 0 : index
    %c32 = arith.constant 32 : index
    %18 = vector.load %arg1[%c0_7, %c32] : memref<2x128xf32, #tpu.memory_space<vmem>>, vector<2x32xf32>
    %c0_8 = arith.constant 0 : index
    %c32_9 = arith.constant 32 : index
    %19 = vector.load %arg2[%c0_8, %c32_9] : memref<2x128xf32, #tpu.memory_space<vmem>>, vector<2x32xf32>
    %20 = arith.mulf %18, %19 : vector<2x32xf32>
    %cst_10 = arith.constant dense<0.000000e+00> : vector<2xf32>
    %21 = vector.multi_reduction <add>, %20, %cst_10 [1] : vector<2x32xf32> to vector<2xf32>
    %22 = vector.shape_cast %21 : vector<2xf32> to vector<2x1xf32>
    %23 = arith.mulf %18, %18 : vector<2x32xf32>
    %cst_11 = arith.constant dense<0.000000e+00> : vector<2xf32>
    %24 = vector.multi_reduction <add>, %23, %cst_11 [1] : vector<2x32xf32> to vector<2xf32>
    %25 = vector.shape_cast %24 : vector<2xf32> to vector<2x1xf32>
    %26 = arith.mulf %19, %19 : vector<2x32xf32>
    %cst_12 = arith.constant dense<0.000000e+00> : vector<2xf32>
    %27 = vector.multi_reduction <add>, %26, %cst_12 [1] : vector<2x32xf32> to vector<2xf32>
    %28 = vector.shape_cast %27 : vector<2xf32> to vector<2x1xf32>
    %29 = arith.mulf %25, %28 : vector<2x1xf32>
    %cst_13 = arith.constant 1.000000e-16 : f32
    %30 = vector.broadcast %cst_13 : f32 to vector<2x1xf32>
    %31 = arith.maximumf %29, %30 : vector<2x1xf32>
    %32 = math.rsqrt %31 : vector<2x1xf32>
    %33 = arith.mulf %22, %32 : vector<2x1xf32>
    %34 = arith.addf %17, %33 : vector<2x1xf32>
    %c0_14 = arith.constant 0 : index
    %c64 = arith.constant 64 : index
    %35 = vector.load %arg1[%c0_14, %c64] : memref<2x128xf32, #tpu.memory_space<vmem>>, vector<2x32xf32>
    %c0_15 = arith.constant 0 : index
    %c64_16 = arith.constant 64 : index
    %36 = vector.load %arg2[%c0_15, %c64_16] : memref<2x128xf32, #tpu.memory_space<vmem>>, vector<2x32xf32>
    %37 = arith.mulf %35, %36 : vector<2x32xf32>
    %cst_17 = arith.constant dense<0.000000e+00> : vector<2xf32>
    %38 = vector.multi_reduction <add>, %37, %cst_17 [1] : vector<2x32xf32> to vector<2xf32>
    %39 = vector.shape_cast %38 : vector<2xf32> to vector<2x1xf32>
    %40 = arith.mulf %35, %35 : vector<2x32xf32>
    %cst_18 = arith.constant dense<0.000000e+00> : vector<2xf32>
    %41 = vector.multi_reduction <add>, %40, %cst_18 [1] : vector<2x32xf32> to vector<2xf32>
    %42 = vector.shape_cast %41 : vector<2xf32> to vector<2x1xf32>
    %43 = arith.mulf %36, %36 : vector<2x32xf32>
    %cst_19 = arith.constant dense<0.000000e+00> : vector<2xf32>
    %44 = vector.multi_reduction <add>, %43, %cst_19 [1] : vector<2x32xf32> to vector<2xf32>
    %45 = vector.shape_cast %44 : vector<2xf32> to vector<2x1xf32>
    %46 = arith.mulf %42, %45 : vector<2x1xf32>
    %cst_20 = arith.constant 1.000000e-16 : f32
    %47 = vector.broadcast %cst_20 : f32 to vector<2x1xf32>
    %48 = arith.maximumf %46, %47 : vector<2x1xf32>
    %49 = math.rsqrt %48 : vector<2x1xf32>
    %50 = arith.mulf %39, %49 : vector<2x1xf32>
    %51 = arith.addf %34, %50 : vector<2x1xf32>
    %c0_21 = arith.constant 0 : index
    %c96 = arith.constant 96 : index
    %52 = vector.load %arg1[%c0_21, %c96] : memref<2x128xf32, #tpu.memory_space<vmem>>, vector<2x32xf32>
    %c0_22 = arith.constant 0 : index
    %c96_23 = arith.constant 96 : index
    %53 = vector.load %arg2[%c0_22, %c96_23] : memref<2x128xf32, #tpu.memory_space<vmem>>, vector<2x32xf32>
    %54 = arith.mulf %52, %53 : vector<2x32xf32>
    %cst_24 = arith.constant dense<0.000000e+00> : vector<2xf32>
    %55 = vector.multi_reduction <add>, %54, %cst_24 [1] : vector<2x32xf32> to vector<2xf32>
    %56 = vector.shape_cast %55 : vector<2xf32> to vector<2x1xf32>
    %57 = arith.mulf %52, %52 : vector<2x32xf32>
    %cst_25 = arith.constant dense<0.000000e+00> : vector<2xf32>
    %58 = vector.multi_reduction <add>, %57, %cst_25 [1] : vector<2x32xf32> to vector<2xf32>
    %59 = vector.shape_cast %58 : vector<2xf32> to vector<2x1xf32>
    %60 = arith.mulf %53, %53 : vector<2x32xf32>
    %cst_26 = arith.constant dense<0.000000e+00> : vector<2xf32>
    %61 = vector.multi_reduction <add>, %60, %cst_26 [1] : vector<2x32xf32> to vector<2xf32>
    %62 = vector.shape_cast %61 : vector<2xf32> to vector<2x1xf32>
    %63 = arith.mulf %59, %62 : vector<2x1xf32>
    %cst_27 = arith.constant 1.000000e-16 : f32
    %64 = vector.broadcast %cst_27 : f32 to vector<2x1xf32>
    %65 = arith.maximumf %63, %64 : vector<2x1xf32>
    %66 = math.rsqrt %65 : vector<2x1xf32>
    %67 = arith.mulf %56, %66 : vector<2x1xf32>
    %68 = arith.addf %51, %67 : vector<2x1xf32>
    %cst_28 = arith.constant dense<0.000000e+00> : vector<1xf32>
    %69 = vector.multi_reduction <add>, %68, %cst_28 [0] : vector<2x1xf32> to vector<1xf32>
    %70 = vector.shape_cast %69 : vector<1xf32> to vector<1x1xf32>
    %71 = tpu.iota {dimensions = array<i32: 0>} : vector<8x1xi32>
    %c0_i32 = arith.constant 0 : i32
    %72 = vector.broadcast %c0_i32 : i32 to vector<8x1xi32>
    %73 = arith.cmpi eq, %71, %72 : vector<8x1xi32>
    %cst_29 = arith.constant 0.000000e+00 : f32
    %74 = vector.shape_cast %70 : vector<1x1xf32> to vector<1x1xf32>
    %75 = vector.broadcast %74 : vector<1x1xf32> to vector<8x1xf32>
    %76 = vector.broadcast %cst_29 : f32 to vector<8x1xf32>
    %77 = arith.select %73, %75, %76 : vector<8x1xi1>, vector<8x1xf32>
    %c0_30 = arith.constant 0 : index
    %c0_31 = arith.constant 0 : index
    %78 = vector.load %arg3[%c0_30, %c0_31] : memref<8x1xf32, #tpu.memory_space<vmem>>, vector<8x1xf32>
    tpu.vector_store %arg3[%c0_30, %c0_31], %77 {strides = array<i32>} : memref<8x1xf32, #tpu.memory_space<vmem>>, vector<8x1xf32>,
    return
  }
  func.func @transform_0(%arg0: i32) -> (i32, i32) {
    %c0_i32 = arith.constant 0 : i32
    %c0_i32_0 = arith.constant 0 : i32
    return %arg0, %c0_i32 : i32, i32
  }
  func.func @transform_1(%arg0: i32) -> (i32, i32) {
    %c0_i32 = arith.constant 0 : i32
    %c0_i32_0 = arith.constant 0 : i32
    return %arg0, %c0_i32 : i32, i32
  }
  func.func @transform_2(%arg0: i32) -> (i32, i32) {
    %c0_i32 = arith.constant 0 : i32
    %c0_i32_0 = arith.constant 0 : i32
    return %arg0, %c0_i32 : i32, i32
  }
}

</mosaic_0001>

<bundles_post_ra>
// kernel: tpu_custom_call.1
= control target key start
LH: loop header
LB: loop body
LE: loop exit
PB: predicated region body
PF: predicated region fallthrough
CT: control target
= control target key end

     0   :  { %7 = vsyncpa [#allocation3], 0  ;;  %s170_s9 = smov [#allocation2]   ;;  %s219_s0 = inlined_call_operand.hbm [shape: f32[2,128], index: 0, kind: input, shape index: {}]   ;;  %s220_s1 = inlined_call_operand.vmem [shape: f32[2,128], index: 1, kind: input, shape index: {}]   ;;  %s221_s2 = inlined_call_operand.vmem [shape: f32[8,1], index: 2, kind: output, shape index: {}]  }
   0x1   :  { %s14_s10 = sshll.u32 %s170_s9, 4  ;;  %s146_s13 = scalar_lea.hbm %s219_s0, 32  ;;  %s15_s10 = int_to_ptr.vmem [resolvable:$true] %s14_s10 }
   0x2   :  { %p147_p0 = scmp.ne.s32.totalorder %s219_s0, %s146_s13  ;;  %p150_p1 = scmp.lt.u32.totalorder %s146_s13, %s219_s0 }
   0x4   :  { %p152_p2 = pnand %p150_p1, %p147_p0 }
   0x6   :  { %155 = shalt.err (!%p152_p2)
}
   0x7   :  { %s156_s18 = scalar_lea.vmem %s15_s10, 32  ;;  %p161_p4 = scmp.lt.s32.totalorder %s15_s10, %s15_s10 }
   0x8   :  { %p157_p3 = scmp.ne.s32.totalorder %s15_s10, %s156_s18  ;;  %p162_p5 = scmp.lt.s32.totalorder %s156_s18, %s156_s18 }
   0xa   :  { %p163_p6 = por %p162_p5, %p161_p4 }
   0xc   :  { %p164_p7 = pnand %p163_p6, %p157_p3 }
   0xe   :  { %167 = shalt.err (!%p164_p7)
}
   0xf   :  { %17 = dma.hbm_to_vmem [thread:$0]  %s219_s0, 32, %s15_s10, [#allocation3]  }
  0x10   :  { %168 = dma.done.wait [#allocation3], 32  }
  0x11   :  { %169 = vsyncadd [#allocation3], 4294967264  ;;  %v24_v0 = vld [vmem:[%s220_s1] sm:$0x3]  ;;  %vm26_vm0 = vcmask 254976   ;;  %s171_s0 = smov 96   ;;  %v123_v59 = vlaneseq }
  0x12   :  { %v23_v1 = vld [vmem:[#allocation2] sm:$0x3]  ;;  %v34_v2 = vmul.f32 %v24_v0, %v24_v0  ;;  %s172_s23 = smov 64   ;;  %s173_s24 = smov 32   ;;  %vm115_vm1 = vcmask 1041408   ;;  %vm127_vm3 = vcmask 7168  }
  0x13   :  { %v25_v3 = vmul.f32 %v24_v0, %v23_v1  ;;  %v30_v4 = vmul.f32 %v23_v1, %v23_v1  ;;  %v124_v62 = vshrl.u32 %v123_v59, 7 }
  0x14   :  { %v35_v5 = vsel %vm26_vm0, %v34_v2, 0.0 }
  0x15   :  { %v27_v6 = vsel %vm26_vm0, %v25_v3, 0.0  ;;  %36 = vadd.xlane.f32.xlu1 %v35_v5  ;;  %v31_v7 = vsel %vm26_vm0, %v30_v4, 0.0  ;;  %vm125_vm2 = vcmp.eq.s32.totalorder %v124_v62, 0 }
  0x16   :  { %28 = vadd.xlane.f32.xlu0 %v27_v6 }
  0x1a   :  { %32 = vadd.xlane.f32.xlu0 %v31_v7 }
  0x26   :  { %44 = vrot.lane.b32.xlu1 %v25_v3, %s171_s0 }
  0x2a   :  { %75 = vrot.lane.b32.xlu1 %v30_v4, %s172_s23 }
  0x2e   :  { %98 = vrot.lane.b32.xlu1 %v30_v4, %s173_s24 }
  0x30   :  { %51 = vrot.lane.b32.xlu0 %v30_v4, %s171_s0 }
  0x32   :  { %104 = vrot.lane.b32.xlu1 %v34_v2, %s173_s24 }
  0x34   :  { %58 = vrot.lane.b32.xlu0 %v34_v2, %s171_s0 }
  0x36   :  { %69 = vrot.lane.b32.xlu1 %v25_v3, %s172_s23 }
  0x38   :  { %81 = vrot.lane.b32.xlu0 %v34_v2, %s172_s23 }
  0x3a   :  { %92 = vrot.lane.b32.xlu1 %v25_v3, %s173_s24 }
  0xa2   :  { %v37_v8 = vpop.xlane.xlu1 %36 }
  0xa3   :  { %v29_v9 = vpop.xlane.xlu0 %28 }
  0xa6   :  { %v45_v10 = vpop.permute.xlu1 %44 }
  0xa7   :  { %v33_v11 = vpop.xlane.xlu0 %32  ;;  %v47_v13 = vsel %vm26_vm0, %v45_v10, 0.0 }
  0xa8   :  { %v38_v12 = vmul.f32 %v37_v8, %v33_v11  ;;  %48 = vadd.xlane.f32.xlu0 %v47_v13 }
  0xaa   :  { %v39_v14 = vmax.f32 %v38_v12, 1e-16  ;;  %v76_v15 = vpop.permute.xlu1 %75 }
  0xab   :  { %v52_v16 = vpop.permute.xlu0 %51  ;;  %v78_v23 = vsel %vm26_vm0, %v76_v15, 0.0 }
  0xac   :  { %138 = vrsqrt.f32 %v39_v14  ;;  %v54_v17 = vsel %vm26_vm0, %v52_v16, 0.0 }
  0xad   :  { %55 = vadd.xlane.f32.xlu1 %v54_v17 }
  0xae   :  { %v99_v18 = vpop.permute.xlu1 %98 }
  0xaf   :  { %v59_v19 = vpop.permute.xlu0 %58  ;;  %v101_v30 = vsel %vm26_vm0, %v99_v18, 0.0 }
  0xb0   :  { %v61_v20 = vsel %vm26_vm0, %v59_v19, 0.0 }
  0xb1   :  { %62 = vadd.xlane.f32.xlu0 %v61_v20 }
  0xb2   :  { %v105_v21 = vpop.permute.xlu1 %104 }
  0xb3   :  { %v82_v22 = vpop.permute.xlu0 %81  ;;  %v107_v32 = vsel %vm26_vm0, %v105_v21, 0.0 }
  0xb4   :  { %v84_v25 = vsel %vm26_vm0, %v82_v22, 0.0 }
  0xb5   :  { %79 = vadd.xlane.f32.xlu0 %v78_v23 }
  0xb6   :  { %v139_v24 = vpop.eup %138  ;;  %v70_v27 = vpop.permute.xlu1 %69 }
  0xb7   :  { %v41_v26 = vmul.f32 %v139_v24, %v29_v9  ;;  %v72_v28 = vsel %vm26_vm0, %v70_v27, 0.0 }
  0xb8   :  { %73 = vadd.xlane.f32.xlu1 %v72_v28 }
  0xb9   :  { %85 = vadd.xlane.f32.xlu0 %v84_v25 }
  0xba   :  { %v93_v29 = vpop.permute.xlu1 %92 }
  0xbb   :  { %v95_v31 = vsel %vm26_vm0, %v93_v29, 0.0 }
  0xbc   :  { %102 = vadd.xlane.f32.xlu1 %v101_v30 }
  0xbd   :  { %96 = vadd.xlane.f32.xlu0 %v95_v31 }
  0xc1   :  { %108 = vadd.xlane.f32.xlu0 %v107_v32 }
 0x135   :  { %v49_v33 = vpop.xlane.xlu0 %48 }
 0x13a   :  { %v56_v35 = vpop.xlane.xlu1 %55 }
 0x13e   :  { %v63_v34 = vpop.xlane.xlu0 %62 }
 0x13f   :  { %v64_v37 = vmul.f32 %v63_v34, %v56_v35 }
 0x141   :  { %v65_v39 = vmax.f32 %v64_v37, 1e-16 }
 0x142   :  { %v80_v36 = vpop.xlane.xlu0 %79 }
 0x143   :  { %140 = vrsqrt.f32 %v65_v39 }
 0x145   :  { %v74_v41 = vpop.xlane.xlu1 %73 }
 0x146   :  { %v86_v38 = vpop.xlane.xlu0 %85 }
 0x147   :  { %v87_v40 = vmul.f32 %v86_v38, %v80_v36 }
 0x149   :  { %v88_v42 = vmax.f32 %v87_v40, 1e-16  ;;  %v103_v44 = vpop.xlane.xlu1 %102 }
 0x14a   :  { %v97_v43 = vpop.xlane.xlu0 %96 }
 0x14b   :  { %142 = vrsqrt.f32 %v88_v42 }
 0x14d   :  { %v141_v48 = vpop.eup %140 }
 0x14e   :  { %v109_v45 = vpop.xlane.xlu0 %108  ;;  %v67_v50 = vmul.f32 %v141_v48, %v49_v33 }
 0x14f   :  { %v110_v46 = vmul.f32 %v109_v45, %v103_v44 }
 0x150   :  { %v68_v52 = vadd.f32 %v67_v50, %v41_v26 }
 0x151   :  { %v111_v47 = vmax.f32 %v110_v46, 1e-16 }
 0x153   :  { %144 = vrsqrt.f32 %v111_v47 }
 0x155   :  { %v143_v49 = vpop.eup %142 }
 0x156   :  { %v90_v51 = vmul.f32 %v143_v49, %v74_v41 }
 0x158   :  { %v91_v54 = vadd.f32 %v90_v51, %v68_v52 }
 0x15d   :  { %v145_v53 = vpop.eup %144 }
 0x15e   :  { %v113_v55 = vmul.f32 %v145_v53, %v97_v43 }
 0x160   :  { %v114_v56 = vadd.f32 %v113_v55, %v91_v54 }
 0x162   :  { %v116_v57 = vsel %vm115_vm1, %v114_v56, 0.0 }
 0x163   :  { %v117_v58 = vrot.slane %v116_v57, 4 }
 0x165   :  { %v118_v60 = vadd.f32 %v117_v58, %v116_v57 }
 0x167   :  { %v119_v61 = vrot.slane %v118_v60, 2 }
 0x169   :  { %v120_v63 = vadd.f32 %v119_v61, %v118_v60 }
 0x16b   :  { %v121_v0 = vrot.slane %v120_v63, 1 }
 0x16d   :  { %v122_v1 = vadd.f32 %v121_v0, %v120_v63 }
 0x16f   :  { %v126_v2 = vsel %vm125_vm2, %v122_v1, 0.0 }
 0x170   :  { %128 = vst.msk [vmem:[%s221_s2] sm:$0xff] %vm127_vm3, %v126_v2 }
 0x171   :  { %133 = vsyncpa [#allocation3], 1 }

</bundles_post_ra>
